<compile_context>
chip_gen: v7x
topology: tpu7x:2x2x1
jax: 0.10.0
libtpu: 0.0.40
codegen_flags: <defaults>
</compile_context>

<pallas_src>
import functools

import jax
import jax.numpy as jnp
import numpy as np
from jax import lax
from jax.experimental import pallas as pl
from jax.experimental.pallas import tpu as pltpu


# ----------------------------- small helpers -------------------------------


def _cdiv(a, b):
    return (a + b - 1) // b


def _round_up(a, b):
    return _cdiv(a, b) * b


def _vmem_capacity_bytes():
    """Per-core VMEM capacity; conservative fallback (v7x = 64 MiB)."""
    try:
        return int(pltpu.get_tpu_info().vmem_capacity_bytes)
    except Exception:
        return 64 << 20


def _pick_ffn_chunk(ffn_dim):
    """Lane-aligned chunk of the FFN hidden dim (bounds the live [TB, F] f32)."""
    if ffn_dim <= 1024:
        return ffn_dim
    for c in (1024, 512, 256, 128):
        if ffn_dim % c == 0:
            return c
    return ffn_dim  # odd ffn_dim (e.g. 2018): single shot, still correct


def _act_vmem_bytes(tile_b, d, ffn_chunk):
    io = 2 * (2 * tile_b * d * 4)                  # double-buffered x and out tiles
    interm = tile_b * (6 * d + 2 * ffn_chunk) * 4  # live f32 intermediates (upper bound)
    return io + interm


def _choose_tile_b(batch, d, ffn_chunk, weight_bytes, budget, tile_b_max):
    if batch <= 8:
        return batch                               # block == full array dims
    # Split the batch over >= 2 grid steps so the "parallel" axis can be
    # sharded across v7x's two TensorCores.
    tile = min(tile_b_max, _round_up(_cdiv(batch, 2), 8))
    while tile > 8 and weight_bytes + _act_vmem_bytes(tile, d, ffn_chunk) > budget:
        tile = _round_up(tile // 2, 8)
    return max(tile, 8)


# -------------------------------- kernel -----------------------------------


def _fused_layer_norm(h, gamma, beta, eps):
    """One-pass LayerNorm: mu = E[h], var = E[h^2] - mu^2 (independent sums)."""
    inv_d = 1.0 / h.shape[-1]
    s1 = jnp.sum(h, axis=-1, keepdims=True)
    s2 = jnp.sum(h * h, axis=-1, keepdims=True)
    mu = s1 * inv_d
    var = jnp.maximum(s2 * inv_d - mu * mu, 0.0)
    return (h - mu) * lax.rsqrt(var + eps) * gamma + beta


def encoder_layer_kernel(
    x_ref,
    wv_ref, bv_ref,                   # value projection (context == v)
    wf_ref, bf_ref,                   # linear_final
    g1_ref, be1_ref,                  # attention LayerNorm
    w1_ref, c1_ref, w2_ref, c2_ref,   # FFN (Conv1d k=1 == Linear)
    g2_ref, be2_ref,                  # FFN LayerNorm
    out_ref,
    *, eps, ffn_chunk,
):
    x = x_ref[...].astype(jnp.float32)            # [TB, D] residual path (f32)
    xb = x.astype(jnp.bfloat16)

    # --- attention: softmax over a single key is exactly 1.0 => context = V ---
    v = jnp.dot(xb, wv_ref[...], preferred_element_type=jnp.float32) + bv_ref[...]

    # --- linear_final + residual + LayerNorm ---
    o = jnp.dot(v.astype(jnp.bfloat16), wf_ref[...],
                preferred_element_type=jnp.float32) + bf_ref[...]
    y = _fused_layer_norm(x + o, g1_ref[...], be1_ref[...], eps)
    yb = y.astype(jnp.bfloat16)

    # --- position-wise FFN (ReLU), hidden dim processed in chunks ---
    ffn_dim = w1_ref.shape[1]
    n_chunks = ffn_dim // ffn_chunk

    if n_chunks == 1:
        f = jnp.maximum(
            jnp.dot(yb, w1_ref[...], preferred_element_type=jnp.float32)
            + c1_ref[...], 0.0)
        o2 = jnp.dot(f.astype(jnp.bfloat16), w2_ref[...],
                     preferred_element_type=jnp.float32)
    else:
        def ffn_step(ci, acc):
            start = pl.multiple_of(ci * ffn_chunk, ffn_chunk)
            f = jnp.maximum(
                jnp.dot(yb, w1_ref[:, pl.ds(start, ffn_chunk)],
                        preferred_element_type=jnp.float32)
                + c1_ref[:, pl.ds(start, ffn_chunk)], 0.0)
            return acc + jnp.dot(f.astype(jnp.bfloat16),
                                 w2_ref[pl.ds(start, ffn_chunk), :],
                                 preferred_element_type=jnp.float32)

        o2 = lax.fori_loop(
            0, n_chunks, ffn_step,
            jnp.zeros((x_ref.shape[0], w2_ref.shape[1]), jnp.float32),
            unroll=True)

    o2 = o2 + c2_ref[...]
    out = _fused_layer_norm(y + o2, g2_ref[...], be2_ref[...], eps)
    out_ref[...] = out.astype(out_ref.dtype)


# ------------------------------- wrapper ------------------------------------


def prepare_params(params):
    """One-time host-side prep: pre-cast MXU weight matrices to bf16
    (f32 accumulation still happens inside the kernel)."""
    out = dict(params)
    for name in ("wv", "wf", "w1", "w2"):
        out[name] = params[name].astype(jnp.bfloat16)
    return out


def encoder_layer(x, params, *, num_heads, out_dtype=jnp.float32, tile_b_max=512):
    """x: [B, model_dim] f32. Returns (output [B, D] out_dtype, attention [B*H,1,1])."""
    B, D = x.shape
    F = params["w1"].shape[1]
    eps = 1e-5

    ffn_chunk = _pick_ffn_chunk(F)

    # Resident parameter footprint: single VMEM copy (no double buffering),
    # bf16 matmul weights + f32 biases/LN params, plus padding slack.
    weight_bytes = 2 * (2 * D * D + 2 * D * F) + 4 * (8 * D + F) + (1 << 20)

    cap = _vmem_capacity_bytes()
    budget = int(cap * 0.70)
    tile_b = _choose_tile_b(B, D, ffn_chunk, weight_bytes, budget, tile_b_max)
    grid = (_cdiv(B, tile_b),)                      # ragged last block is masked by Pallas

    est = weight_bytes + _act_vmem_bytes(tile_b, D, ffn_chunk)
    vmem_limit = int(min(max(est + (8 << 20), 32 << 20), int(cap * 0.85)))

    # astype below is a no-op when params come from prepare_params() (and is
    # folded by jit otherwise).
    args = (
        x,
        params["wv"].astype(jnp.bfloat16), params["bv"],
        params["wf"].astype(jnp.bfloat16), params["bf"],
        params["ln1_w"], params["ln1_b"],
        params["w1"].astype(jnp.bfloat16), params["c1"],
        params["w2"].astype(jnp.bfloat16), params["c2"],
        params["ln2_w"], params["ln2_b"],
    )

    # Whole-array VMEM operands: loaded once, single buffer (no 2x pipeline
    # buffering of grid-invariant weights).
    resident = pl.BlockSpec(memory_space=pltpu.MemorySpace.VMEM)
    x_spec = pl.BlockSpec((tile_b, D), lambda i: (i, 0))
    out_spec = pl.BlockSpec((tile_b, D), lambda i: (i, 0))
    in_specs = [x_spec] + [resident] * (len(args) - 1)

    kernel = functools.partial(encoder_layer_kernel, eps=eps, ffn_chunk=ffn_chunk)

    out = pl.pallas_call(
        kernel,
        out_shape=jax.ShapeDtypeStruct((B, D), out_dtype),
        grid=grid,
        in_specs=in_specs,
        out_specs=out_spec,
        compiler_params=pltpu.CompilerParams(
            dimension_semantics=("parallel",),
            vmem_limit_bytes=vmem_limit,
        ),
    )(*args)

    # Softmax over one key position == 1.0 exactly (matches PyTorch output).
    attn = jnp.ones((B * num_heads, 1, 1), jnp.float32)
    return out, attn


# ------------------------------ reference -----------------------------------


def _reference(x, params, *, num_heads):
    """Pure-JAX mirror of the PyTorch forward for 2-D input.

    Matmul operands are cast to bf16 (f32 accumulation) to mirror the kernel's
    MXU precision choice; everything else is f32.
    """
    B, D = x.shape
    dph = D // num_heads
    scale = (dph // num_heads) ** (-0.5)   # PyTorch uses integer floor division
    eps = 1e-5
    bf16 = jnp.bfloat16

    def mm(a, w):
        return jnp.dot(a.astype(bf16), w.astype(bf16),
                       preferred_element_type=jnp.float32)

    def ln(h, w, b):
        mu = jnp.mean(h, axis=-1, keepdims=True)
        var = jnp.mean((h - mu) ** 2, axis=-1, keepdims=True)
        return (h - mu) / jnp.sqrt(var + eps) * w + b

    q = mm(x, params["wq"]) + params["bq"][0]
    k = mm(x, params["wk"]) + params["bk"][0]
    v = mm(x, params["wv"]) + params["bv"][0]
    qh = q.reshape(B * num_heads, 1, dph)
    kh = k.reshape(B * num_heads, 1, dph)
    vh = v.reshape(B * num_heads, 1, dph)
    att = jnp.einsum("bld,bmd->blm", qh, kh) * scale
    att = jax.nn.softmax(att, axis=2)
    ctx = jnp.einsum("blm,bmd->bld", att, vh).reshape(B, D)
    o = mm(ctx, params["wf"]) + params["bf"][0]
    y = ln(x + o, params["ln1_w"][0], params["ln1_b"][0])
    f = jax.nn.relu(mm(y, params["w1"]) + params["c1"][0])
    o2 = mm(f, params["w2"]) + params["c2"][0]
    out = ln(y + o2, params["ln2_w"][0], params["ln2_b"][0])
    return out, att


# --------------------------------- demo --------------------------------------


if __name__ == "__main__":
    # Small, consistent shapes: batch=2, model_dim=32, num_heads=4, ffn_dim=64.
    B, D, H, F = 2, 32, 4, 64
    key = jax.random.PRNGKey(0)
    ks = jax.random.split(key, 16)

    def mat(k, shape, s=0.1):
        return jax.random.normal(k, shape, jnp.float32) * s

    params = {
        # Linear weights as [in, out] (transposed vs. PyTorch [out, in]).
        "wq": mat(ks[0], (D, D)), "bq": mat(ks[1], (1, D)),
        "wk": mat(ks[2], (D, D)), "bk": mat(ks[3], (1, D)),
        "wv": mat(ks[4], (D, D)), "bv": mat(ks[5], (1, D)),
        "wf": mat(ks[6], (D, D)), "bf": mat(ks[7], (1, D)),
        "ln1_w": jnp.ones((1, D), jnp.float32),
        "ln1_b": jnp.zeros((1, D), jnp.float32),
        # Conv1d(k=1) weights [out, in, 1] stored as [in, out].
        "w1": mat(ks[8], (D, F)), "c1": mat(ks[9], (1, F)),
        "w2": mat(ks[10], (F, D)), "c2": mat(ks[11], (1, D)),
        "ln2_w": jnp.ones((1, D), jnp.float32),
        "ln2_b": jnp.zeros((1, D), jnp.float32),
    }

    x = jax.random.normal(ks[12], (B, D), jnp.float32)

    prepared = prepare_params(params)          # one-time bf16 weight cast (hoisted)
    layer = jax.jit(functools.partial(encoder_layer, num_heads=H))
    out, attn = layer(x, prepared)
    out, attn = jax.block_until_ready((out, attn))

    ref_out, ref_attn = _reference(x, params, num_heads=H)
    np.testing.assert_allclose(np.asarray(out), np.asarray(ref_out),
                               rtol=2e-3, atol=2e-3)
    np.testing.assert_allclose(np.asarray(attn),
                               np.asarray(ref_attn).reshape(B * H, 1, 1),
                               rtol=1e-6, atol=1e-6)
    assert out.shape == (B, D) and attn.shape == (B * H, 1, 1)
    print("KERNEL_OK")
</pallas_src>

<mosaic_0001>
module attributes {stable_mosaic.version = 11 : i64} {
  func.func @encoder_layer_kernel(%arg0: i32, %arg1: memref<2x32xf32, #tpu.memory_space<vmem>>, %arg2: memref<32x32xbf16, #tpu.memory_space<vmem>>, %arg3: memref<1x32xf32, #tpu.memory_space<vmem>>, %arg4: memref<32x32xbf16, #tpu.memory_space<vmem>>, %arg5: memref<1x32xf32, #tpu.memory_space<vmem>>, %arg6: memref<1x32xf32, #tpu.memory_space<vmem>>, %arg7: memref<1x32xf32, #tpu.memory_space<vmem>>, %arg8: memref<32x64xbf16, #tpu.memory_space<vmem>>, %arg9: memref<1x64xf32, #tpu.memory_space<vmem>>, %arg10: memref<64x32xbf16, #tpu.memory_space<vmem>>, %arg11: memref<1x32xf32, #tpu.memory_space<vmem>>, %arg12: memref<1x32xf32, #tpu.memory_space<vmem>>, %arg13: memref<1x32xf32, #tpu.memory_space<vmem>>, %arg14: memref<2x32xf32, #tpu.memory_space<vmem>>) attributes {dimension_semantics = [#tpu.dimension_semantics<parallel>], iteration_bounds = array<i64: 1>, scalar_prefetch = 0 : i64, scratch_operands = 0 : i64, tpu.core_type = #tpu.core_type<tc>, window_params = [{transform_indices = @transform_0, window_bounds = array<i64: 2, 32>}, {pipeline_mode = #tpu.pipeline_mode<synchronous>, transform_indices = @transform_1, window_bounds = array<i64: 32, 32>}, {pipeline_mode = #tpu.pipeline_mode<synchronous>, transform_indices = @transform_2, window_bounds = array<i64: 1, 32>}, {pipeline_mode = #tpu.pipeline_mode<synchronous>, transform_indices = @transform_3, window_bounds = array<i64: 32, 32>}, {pipeline_mode = #tpu.pipeline_mode<synchronous>, transform_indices = @transform_4, window_bounds = array<i64: 1, 32>}, {pipeline_mode = #tpu.pipeline_mode<synchronous>, transform_indices = @transform_5, window_bounds = array<i64: 1, 32>}, {pipeline_mode = #tpu.pipeline_mode<synchronous>, transform_indices = @transform_6, window_bounds = array<i64: 1, 32>}, {pipeline_mode = #tpu.pipeline_mode<synchronous>, transform_indices = @transform_7, window_bounds = array<i64: 32, 64>}, {pipeline_mode = #tpu.pipeline_mode<synchronous>, transform_indices = @transform_8, window_bounds = array<i64: 1, 64>}, {pipeline_mode = #tpu.pipeline_mode<synchronous>, transform_indices = @transform_9, window_bounds = array<i64: 64, 32>}, {pipeline_mode = #tpu.pipeline_mode<synchronous>, transform_indices = @transform_10, window_bounds = array<i64: 1, 32>}, {pipeline_mode = #tpu.pipeline_mode<synchronous>, transform_indices = @transform_11, window_bounds = array<i64: 1, 32>}, {pipeline_mode = #tpu.pipeline_mode<synchronous>, transform_indices = @transform_12, window_bounds = array<i64: 1, 32>}, {transform_indices = @transform_13, window_bounds = array<i64: 2, 32>}]} {
    %c0 = arith.constant 0 : index
    %c0_0 = arith.constant 0 : index
    %0 = vector.load %arg1[%c0, %c0_0] : memref<2x32xf32, #tpu.memory_space<vmem>>, vector<2x32xf32>
    %1 = arith.truncf %0 : vector<2x32xf32> to vector<2x32xbf16>
    %c0_1 = arith.constant 0 : index
    %c0_2 = arith.constant 0 : index
    %2 = vector.load %arg2[%c0_1, %c0_2] : memref<32x32xbf16, #tpu.memory_space<vmem>>, vector<32x32xbf16>
    %cst = arith.constant dense<0.000000e+00> : vector<2x32xf32>
    %3 = tpu.matmul %1, %2, %cst {dimension_numbers = #tpu.dot_dimension_numbers<[1], [0], [0], [1], [0, 0, 1, 1], [], []>} : vector<2x32xbf16>, vector<32x32xbf16>, vector<2x32xf32> -> vector<2x32xf32>
    %c0_3 = arith.constant 0 : index
    %c0_4 = arith.constant 0 : index
    %4 = vector.load %arg3[%c0_3, %c0_4] : memref<1x32xf32, #tpu.memory_space<vmem>>, vector<1x32xf32>
    %5 = vector.broadcast %4 : vector<1x32xf32> to vector<2x32xf32>
    %6 = arith.addf %3, %5 : vector<2x32xf32>
    %7 = arith.truncf %6 : vector<2x32xf32> to vector<2x32xbf16>
    %c0_5 = arith.constant 0 : index
    %c0_6 = arith.constant 0 : index
    %8 = vector.load %arg4[%c0_5, %c0_6] : memref<32x32xbf16, #tpu.memory_space<vmem>>, vector<32x32xbf16>
    %cst_7 = arith.constant dense<0.000000e+00> : vector<2x32xf32>
    %9 = tpu.matmul %7, %8, %cst_7 {dimension_numbers = #tpu.dot_dimension_numbers<[1], [0], [0], [1], [0, 0, 1, 1], [], []>} : vector<2x32xbf16>, vector<32x32xbf16>, vector<2x32xf32> -> vector<2x32xf32>
    %c0_8 = arith.constant 0 : index
    %c0_9 = arith.constant 0 : index
    %10 = vector.load %arg5[%c0_8, %c0_9] : memref<1x32xf32, #tpu.memory_space<vmem>>, vector<1x32xf32>
    %11 = vector.broadcast %10 : vector<1x32xf32> to vector<2x32xf32>
    %12 = arith.addf %9, %11 : vector<2x32xf32>
    %13 = arith.addf %0, %12 : vector<2x32xf32>
    %c0_10 = arith.constant 0 : index
    %c0_11 = arith.constant 0 : index
    %14 = vector.load %arg6[%c0_10, %c0_11] : memref<1x32xf32, #tpu.memory_space<vmem>>, vector<1x32xf32>
    %c0_12 = arith.constant 0 : index
    %c0_13 = arith.constant 0 : index
    %15 = vector.load %arg7[%c0_12, %c0_13] : memref<1x32xf32, #tpu.memory_space<vmem>>, vector<1x32xf32>
    %cst_14 = arith.constant dense<0.000000e+00> : vector<2xf32>
    %16 = vector.multi_reduction <add>, %13, %cst_14 [1] : vector<2x32xf32> to vector<2xf32>
    %17 = vector.shape_cast %16 : vector<2xf32> to vector<2x1xf32>
    %18 = arith.mulf %13, %13 : vector<2x32xf32>
    %cst_15 = arith.constant dense<0.000000e+00> : vector<2xf32>
    %19 = vector.multi_reduction <add>, %18, %cst_15 [1] : vector<2x32xf32> to vector<2xf32>
    %20 = vector.shape_cast %19 : vector<2xf32> to vector<2x1xf32>
    %cst_16 = arith.constant 3.125000e-02 : f32
    %21 = vector.broadcast %cst_16 : f32 to vector<2x1xf32>
    %22 = arith.mulf %17, %21 : vector<2x1xf32>
    %cst_17 = arith.constant 3.125000e-02 : f32
    %23 = vector.broadcast %cst_17 : f32 to vector<2x1xf32>
    %24 = arith.mulf %20, %23 : vector<2x1xf32>
    %25 = arith.mulf %22, %22 : vector<2x1xf32>
    %26 = arith.subf %24, %25 : vector<2x1xf32>
    %cst_18 = arith.constant 0.000000e+00 : f32
    %27 = vector.broadcast %cst_18 : f32 to vector<2x1xf32>
    %28 = arith.maximumf %26, %27 : vector<2x1xf32>
    %29 = vector.broadcast %22 : vector<2x1xf32> to vector<2x32xf32>
    %30 = arith.subf %13, %29 : vector<2x32xf32>
    %cst_19 = arith.constant 9.99999974E-6 : f32
    %31 = vector.broadcast %cst_19 : f32 to vector<2x1xf32>
    %32 = arith.addf %28, %31 : vector<2x1xf32>
    %33 = math.rsqrt %32 : vector<2x1xf32>
    %34 = vector.broadcast %33 : vector<2x1xf32> to vector<2x32xf32>
    %35 = arith.mulf %30, %34 : vector<2x32xf32>
    %36 = vector.broadcast %14 : vector<1x32xf32> to vector<2x32xf32>
    %37 = arith.mulf %35, %36 : vector<2x32xf32>
    %38 = vector.broadcast %15 : vector<1x32xf32> to vector<2x32xf32>
    %39 = arith.addf %37, %38 : vector<2x32xf32>
    %40 = arith.truncf %39 : vector<2x32xf32> to vector<2x32xbf16>
    %c0_20 = arith.constant 0 : index
    %c0_21 = arith.constant 0 : index
    %41 = vector.load %arg8[%c0_20, %c0_21] : memref<32x64xbf16, #tpu.memory_space<vmem>>, vector<32x64xbf16>
    %cst_22 = arith.constant dense<0.000000e+00> : vector<2x64xf32>
    %42 = tpu.matmul %40, %41, %cst_22 {dimension_numbers = #tpu.dot_dimension_numbers<[1], [0], [0], [1], [0, 0, 1, 1], [], []>} : vector<2x32xbf16>, vector<32x64xbf16>, vector<2x64xf32> -> vector<2x64xf32>
    %c0_23 = arith.constant 0 : index
    %c0_24 = arith.constant 0 : index
    %43 = vector.load %arg9[%c0_23, %c0_24] : memref<1x64xf32, #tpu.memory_space<vmem>>, vector<1x64xf32>
    %44 = vector.broadcast %43 : vector<1x64xf32> to vector<2x64xf32>
    %45 = arith.addf %42, %44 : vector<2x64xf32>
    %cst_25 = arith.constant 0.000000e+00 : f32
    %46 = vector.broadcast %cst_25 : f32 to vector<2x64xf32>
    %47 = arith.maximumf %45, %46 : vector<2x64xf32>
    %48 = arith.truncf %47 : vector<2x64xf32> to vector<2x64xbf16>
    %c0_26 = arith.constant 0 : index
    %c0_27 = arith.constant 0 : index
    %49 = vector.load %arg10[%c0_26, %c0_27] : memref<64x32xbf16, #tpu.memory_space<vmem>>, vector<64x32xbf16>
    %cst_28 = arith.constant dense<0.000000e+00> : vector<2x32xf32>
    %50 = tpu.matmul %48, %49, %cst_28 {dimension_numbers = #tpu.dot_dimension_numbers<[1], [0], [0], [1], [0, 0, 1, 1], [], []>} : vector<2x64xbf16>, vector<64x32xbf16>, vector<2x32xf32> -> vector<2x32xf32>
    %c0_29 = arith.constant 0 : index
    %c0_30 = arith.constant 0 : index
    %51 = vector.load %arg11[%c0_29, %c0_30] : memref<1x32xf32, #tpu.memory_space<vmem>>, vector<1x32xf32>
    %52 = vector.broadcast %51 : vector<1x32xf32> to vector<2x32xf32>
    %53 = arith.addf %50, %52 : vector<2x32xf32>
    %54 = arith.addf %39, %53 : vector<2x32xf32>
    %c0_31 = arith.constant 0 : index
    %c0_32 = arith.constant 0 : index
    %55 = vector.load %arg12[%c0_31, %c0_32] : memref<1x32xf32, #tpu.memory_space<vmem>>, vector<1x32xf32>
    %c0_33 = arith.constant 0 : index
    %c0_34 = arith.constant 0 : index
    %56 = vector.load %arg13[%c0_33, %c0_34] : memref<1x32xf32, #tpu.memory_space<vmem>>, vector<1x32xf32>
    %cst_35 = arith.constant dense<0.000000e+00> : vector<2xf32>
    %57 = vector.multi_reduction <add>, %54, %cst_35 [1] : vector<2x32xf32> to vector<2xf32>
    %58 = vector.shape_cast %57 : vector<2xf32> to vector<2x1xf32>
    %59 = arith.mulf %54, %54 : vector<2x32xf32>
    %cst_36 = arith.constant dense<0.000000e+00> : vector<2xf32>
    %60 = vector.multi_reduction <add>, %59, %cst_36 [1] : vector<2x32xf32> to vector<2xf32>
    %61 = vector.shape_cast %60 : vector<2xf32> to vector<2x1xf32>
    %cst_37 = arith.constant 3.125000e-02 : f32
    %62 = vector.broadcast %cst_37 : f32 to vector<2x1xf32>
    %63 = arith.mulf %58, %62 : vector<2x1xf32>
    %cst_38 = arith.constant 3.125000e-02 : f32
    %64 = vector.broadcast %cst_38 : f32 to vector<2x1xf32>
    %65 = arith.mulf %61, %64 : vector<2x1xf32>
    %66 = arith.mulf %63, %63 : vector<2x1xf32>
    %67 = arith.subf %65, %66 : vector<2x1xf32>
    %cst_39 = arith.constant 0.000000e+00 : f32
    %68 = vector.broadcast %cst_39 : f32 to vector<2x1xf32>
    %69 = arith.maximumf %67, %68 : vector<2x1xf32>
    %70 = vector.broadcast %63 : vector<2x1xf32> to vector<2x32xf32>
    %71 = arith.subf %54, %70 : vector<2x32xf32>
    %cst_40 = arith.constant 9.99999974E-6 : f32
    %72 = vector.broadcast %cst_40 : f32 to vector<2x1xf32>
    %73 = arith.addf %69, %72 : vector<2x1xf32>
    %74 = math.rsqrt %73 : vector<2x1xf32>
    %75 = vector.broadcast %74 : vector<2x1xf32> to vector<2x32xf32>
    %76 = arith.mulf %71, %75 : vector<2x32xf32>
    %77 = vector.broadcast %55 : vector<1x32xf32> to vector<2x32xf32>
    %78 = arith.mulf %76, %77 : vector<2x32xf32>
    %79 = vector.broadcast %56 : vector<1x32xf32> to vector<2x32xf32>
    %80 = arith.addf %78, %79 : vector<2x32xf32>
    %c0_41 = arith.constant 0 : index
    %c0_42 = arith.constant 0 : index
    %81 = vector.load %arg14[%c0_41, %c0_42] : memref<2x32xf32, #tpu.memory_space<vmem>>, vector<2x32xf32>
    tpu.vector_store %arg14[%c0_41, %c0_42], %80 {strides = array<i32>} : memref<2x32xf32, #tpu.memory_space<vmem>>, vector<2x32xf32>,
    return
  }
  func.func @transform_0(%arg0: i32) -> (i32, i32) {
    %c0_i32 = arith.constant 0 : i32
    %c0_i32_0 = arith.constant 0 : i32
    return %arg0, %c0_i32 : i32, i32
  }
  func.func @transform_1(%arg0: i32) -> (i32, i32) {
    %c0_i32 = arith.constant 0 : i32
    %c0_i32_0 = arith.constant 0 : i32
    %c0_i32_1 = arith.constant 0 : i32
    return %c0_i32, %c0_i32_0 : i32, i32
  }
  func.func @transform_2(%arg0: i32) -> (i32, i32) {
    %c0_i32 = arith.constant 0 : i32
    %c0_i32_0 = arith.constant 0 : i32
    %c0_i32_1 = arith.constant 0 : i32
    return %c0_i32, %c0_i32_0 : i32, i32
  }
  func.func @transform_3(%arg0: i32) -> (i32, i32) {
    %c0_i32 = arith.constant 0 : i32
    %c0_i32_0 = arith.constant 0 : i32
    %c0_i32_1 = arith.constant 0 : i32
    return %c0_i32, %c0_i32_0 : i32, i32
  }
  func.func @transform_4(%arg0: i32) -> (i32, i32) {
    %c0_i32 = arith.constant 0 : i32
    %c0_i32_0 = arith.constant 0 : i32
    %c0_i32_1 = arith.constant 0 : i32
    return %c0_i32, %c0_i32_0 : i32, i32
  }
  func.func @transform_5(%arg0: i32) -> (i32, i32) {
    %c0_i32 = arith.constant 0 : i32
    %c0_i32_0 = arith.constant 0 : i32
    %c0_i32_1 = arith.constant 0 : i32
    return %c0_i32, %c0_i32_0 : i32, i32
  }
  func.func @transform_6(%arg0: i32) -> (i32, i32) {
    %c0_i32 = arith.constant 0 : i32
    %c0_i32_0 = arith.constant 0 : i32
    %c0_i32_1 = arith.constant 0 : i32
    return %c0_i32, %c0_i32_0 : i32, i32
  }
  func.func @transform_7(%arg0: i32) -> (i32, i32) {
    %c0_i32 = arith.constant 0 : i32
    %c0_i32_0 = arith.constant 0 : i32
    %c0_i32_1 = arith.constant 0 : i32
    return %c0_i32, %c0_i32_0 : i32, i32
  }
  func.func @transform_8(%arg0: i32) -> (i32, i32) {
    %c0_i32 = arith.constant 0 : i32
    %c0_i32_0 = arith.constant 0 : i32
    %c0_i32_1 = arith.constant 0 : i32
    return %c0_i32, %c0_i32_0 : i32, i32
  }
  func.func @transform_9(%arg0: i32) -> (i32, i32) {
    %c0_i32 = arith.constant 0 : i32
    %c0_i32_0 = arith.constant 0 : i32
    %c0_i32_1 = arith.constant 0 : i32
    return %c0_i32, %c0_i32_0 : i32, i32
  }
  func.func @transform_10(%arg0: i32) -> (i32, i32) {
    %c0_i32 = arith.constant 0 : i32
    %c0_i32_0 = arith.constant 0 : i32
    %c0_i32_1 = arith.constant 0 : i32
    return %c0_i32, %c0_i32_0 : i32, i32
  }
  func.func @transform_11(%arg0: i32) -> (i32, i32) {
    %c0_i32 = arith.constant 0 : i32
    %c0_i32_0 = arith.constant 0 : i32
    %c0_i32_1 = arith.constant 0 : i32
    return %c0_i32, %c0_i32_0 : i32, i32
  }
  func.func @transform_12(%arg0: i32) -> (i32, i32) {
    %c0_i32 = arith.constant 0 : i32
    %c0_i32_0 = arith.constant 0 : i32
    %c0_i32_1 = arith.constant 0 : i32
    return %c0_i32, %c0_i32_0 : i32, i32
  }
  func.func @transform_13(%arg0: i32) -> (i32, i32) {
    %c0_i32 = arith.constant 0 : i32
    %c0_i32_0 = arith.constant 0 : i32
    return %arg0, %c0_i32 : i32, i32
  }
}

</mosaic_0001>

<bundles_post_ra>
// kernel: encoder_layer.1
= control target key start
LH: loop header
LB: loop body
LE: loop exit
PB: predicated region body
PF: predicated region fallthrough
CT: control target
= control target key end

     0   :  { %18 = vsyncpa [#allocation3], 0  ;;  %s745_s0 = inlined_call_operand.hbm [shape: f32[2,32], index: 0, kind: input, shape index: {}]   ;;  %s746_s1 = inlined_call_operand.vmem [shape: bf16[32,32], index: 1, kind: input, shape index: {}]   ;;  %s747_s2 = inlined_call_operand.vmem [shape: f32[1,32], index: 2, kind: input, shape index: {}]   ;;  %s748_s3 = inlined_call_operand.vmem [shape: bf16[32,32], index: 3, kind: input, shape index: {}]   ;;  %s749_s4 = inlined_call_operand.vmem [shape: f32[1,32], index: 4, kind: input, shape index: {}]   ;;  %s750_s5 = inlined_call_operand.vmem [shape: f32[1,32], index: 5, kind: input, shape index: {}]   ;;  %s751_s6 = inlined_call_operand.vmem [shape: f32[1,32], index: 6, kind: input, shape index: {}]   ;;  %s752_s7 = inlined_call_operand.vmem [shape: bf16[32,64], index: 7, kind: input, shape index: {}]   ;;  %s753_s8 = inlined_call_operand.vmem [shape: f32[1,64], index: 8, kind: input, shape index: {}]   ;;  %s754_s9 = inlined_call_operand.vmem [shape: bf16[64,32], index: 9, kind: input, shape index: {}]   ;;  %s755_s10 = inlined_call_operand.vmem [shape: f32[1,32], index: 10, kind: input, shape index: {}]   ;;  %s756_s11 = inlined_call_operand.vmem [shape: f32[1,32], index: 11, kind: input, shape index: {}]   ;;  %s757_s12 = inlined_call_operand.vmem [shape: f32[1,32], index: 12, kind: input, shape index: {}]   ;;  %s758_s13 = inlined_call_operand.hbm [shape: f32[2,32], index: 13, kind: output, shape index: {}]  }
   0x1   :  { %19 = vsyncpa [#allocation4], 0  ;;  %s567_s25 = smov [#allocation2]   ;;  %s519_s29 = scalar_lea.hbm %s745_s0, 32 }
   0x2   :  { %s26_s26 = sshll.u32 %s567_s25, 4  ;;  %p520_p0 = scmp.ne.s32.totalorder %s745_s0, %s519_s29  ;;  %s27_s26 = int_to_ptr.vmem [resolvable:$true] %s26_s26 }
   0x3   :  { %p523_p1 = scmp.lt.u32.totalorder %s519_s29, %s745_s0 }
   0x5   :  { %p525_p2 = pnand %p523_p1, %p520_p0 }
   0x7   :  { %528 = shalt.err (!%p525_p2)
}
   0x8   :  { %s529_s17 = scalar_lea.vmem %s27_s26, 32  ;;  %p534_p4 = scmp.lt.s32.totalorder %s27_s26, %s27_s26 }
   0x9   :  { %p530_p3 = scmp.ne.s32.totalorder %s27_s26, %s529_s17  ;;  %p535_p5 = scmp.lt.s32.totalorder %s529_s17, %s529_s17 }
   0xb   :  { %p536_p6 = por %p535_p5, %p534_p4 }
   0xd   :  { %p537_p7 = pnand %p536_p6, %p530_p3 }
   0xf   :  { %540 = shalt.err (!%p537_p7)
}
  0x10   :  { %29 = dma.hbm_to_vmem [thread:$0]  %s745_s0, 32, %s27_s26, [#allocation3]  }
  0x11   :  { %563 = dma.done.wait [#allocation3], 32  }
  0x12   :  { %564 = vsyncadd [#allocation3], 4294967264  ;;  %v568_v0 = vmov 0.0   ;;  %vm569_vm0 = vmmov 0   ;;  %v505_v1 = vld [vmem:[%s746_s1] sm:$0xff]   ;;  %v506_v2 = vld [vmem:[%s746_s1 + $0x8] sm:$0xff]  }
  0x13   :  { %465 = vmatprep.subr.bf16.mxu0 %v568_v0  ;;  %469 = vmatprep.mubr.msk.bf16.mxu0 %vm569_vm0, %v568_v0  ;;  %v58_v3 = vld [vmem:[#allocation2] sm:$0x3]  ;;  %vm83_vm1 = vcmask 261120   ;;  %v508_v6 = vld [vmem:[%s748_s3 + $0x8] sm:$0xff]   ;;  %vm197_vm2 = vcmask 254976   ;;  %v513_v44 = vld [vmem:[%s754_s9 + $0x10] sm:$0xff]  }
  0x14   :  { %473 = vmatprep.subr.bf16.mxu1 %v568_v0  ;;  %477 = vmatprep.mubr.msk.bf16.mxu1 %vm569_vm0, %v568_v0  ;;  %v507_v4 = vld [vmem:[%s748_s3] sm:$0xff]   ;;  %v59_v5 = vpack.c.bf16 %v58_v3, %v58_v3  ;;  %v510_v25 = vld [vmem:[%s752_s7 + $0x8] sm:$0xff]   ;;  %v514_v45 = vld [vmem:[%s754_s9 + $0x18] sm:$0xff]   ;;  %vm336_vm3 = vcmask 523264   ;;  %s570_s26 = smov [#allocation5]  }
  0x15   :  { %466 = vmatpush3.bf16.msra.mxu0 %v505_v1  ;;  %474 = vmatpush3.bf16.msra.mxu1 %v507_v4  ;;  %v429_v7 = vld [vmem:[%s747_s2] ss:$0 sm:$0xff]  ;;  %v512_v27 = vld [vmem:[%s754_s9 + $0x8] sm:$0xff]   ;;  %s420_s27 = sshll.u32 %s570_s26, 4  ;;  %s421_s27 = int_to_ptr.vmem [resolvable:$true] %s420_s27 }
  0x16   :  { %467 = vmatprep.subr.bf16.mxu0 %v568_v0  ;;  %475 = vmatprep.subr.bf16.mxu1 %v568_v0  ;;  %v433_v14 = vld [vmem:[%s749_s4] ss:$0 sm:$0xff]  ;;  %s541_s28 = scalar_lea.vmem %s421_s27, 32  ;;  %p546_p9 = scmp.lt.s32.totalorder %s421_s27, %s421_s27 }
  0x17   :  { %v509_v24 = vld [vmem:[%s752_s7] sm:$0xff]   ;;  %p542_p8 = scmp.ne.s32.totalorder %s421_s27, %s541_s28  ;;  %p547_p10 = scmp.lt.s32.totalorder %s541_s28, %s541_s28 }
  0x18   :  { %v511_v26 = vld [vmem:[%s754_s9] sm:$0xff]  }
  0x19   :  { %468 = vmatpush3.bf16.msra.mxu0 %v506_v2  ;;  %476 = vmatpush3.bf16.msra.mxu1 %v508_v6  ;;  %v437_v38 = vld [vmem:[%s750_s5] ss:$0 sm:$0xff]  ;;  %p548_p11 = por %p547_p10, %p546_p9 }
  0x1a   :  { %481 = vmatprep.subr.bf16.mxu0 %v568_v0  ;;  %489 = vmatprep.subr.bf16.mxu1 %v568_v0  ;;  %v438_v40 = vld [vmem:[%s751_s6] ss:$0 sm:$0xff] }
  0x1b   :  { %v439_v46 = vld [vmem:[%s753_s8] ss:$0 sm:$0xff]  ;;  %p549_p12 = pnand %p548_p11, %p542_p8 }
  0x1c   :  { %470 = vmatmul.mubr.msk.bf16.vlgmr.msra.gmra.mrb[0].mxu0 %vm83_vm1, %v59_v5  ;;  %v443_v54 = vld [vmem:[%s755_s10] ss:$0 sm:$0xff] }
  0x1d   :  { %485 = vmatprep.mubr.msk.bf16.mxu0 %vm569_vm0, %v568_v0  ;;  %482 = vmatpush3.bf16.msra.mxu0 %v509_v24 }
  0x1e   :  { %483 = vmatprep.subr.bf16.mxu0 %v568_v0 }
  0x21   :  { %484 = vmatpush3.bf16.msra.mxu0 %v510_v25 }
  0xef   :  { %v121_v8 = vpop.f32.mrb[0].mxu0 }
  0xf0   :  { %v122_v9 = vadd.f32 %v429_v7, %v121_v8  ;;  %v471_v10 = vpop.f32.mrb[1].mxu0 }
  0xf1   :  { %v124_v11 = vpop.f32.mrb[2].mxu0  ;;  %v449_v10 = vld [vmem:[%s756_s11] ss:$0 sm:$0xff] }
  0xf2   :  { %v127_v12 = vpack.c.bf16 %v122_v9, %v122_v9  ;;  %v472_v13 = vpop.f32.mrb[3].mxu0 }
  0xf4   :  { %478 = vmatmul.mubr.msk.bf16.vlgmr.msra.gmra.mrb[0].mxu1 %vm83_vm1, %v127_v12  ;;  %v450_v12 = vld [vmem:[%s757_s12] ss:$0 sm:$0xff] }
  0xf5   :  { %497 = vmatprep.mubr.msk.bf16.mxu1 %vm569_vm0, %v568_v0  ;;  %490 = vmatpush3.bf16.msra.mxu1 %v511_v26 }
  0xf6   :  { %491 = vmatprep.subr.bf16.mxu1 %v568_v0 }
  0xf9   :  { %492 = vmatpush3.bf16.msra.mxu1 %v512_v27 }
  0xfa   :  { %493 = vmatprep.subr.bf16.mxu1 %v568_v0 }
  0xfd   :  { %494 = vmatpush3.bf16.msra.mxu1 %v513_v44 }
  0xfe   :  { %495 = vmatprep.subr.bf16.mxu1 %v568_v0 }
 0x101   :  { %496 = vmatpush3.bf16.msra.mxu1 %v514_v45 }
 0x1c7   :  { %v188_v15 = vpop.f32.mrb[0].mxu1 }
 0x1c8   :  { %v189_v16 = vadd.f32 %v433_v14, %v188_v15  ;;  %v479_v17 = vpop.f32.mrb[1].mxu1 }
 0x1c9   :  { %v191_v18 = vpop.f32.mrb[2].mxu1 }
 0x1ca   :  { %v194_v19 = vadd.f32 %v189_v16, %v58_v3  ;;  %v480_v20 = vpop.f32.mrb[3].mxu1 }
 0x1cc   :  { %v198_v21 = vsel %vm197_vm2, %v194_v19, 0.0  ;;  %v201_v22 = vmul.f32 %v194_v19, %v194_v19 }
 0x1cd   :  { %199 = vadd.xlane.f32.xlu0 %v198_v21 }
 0x1ce   :  { %v202_v23 = vsel %vm197_vm2, %v201_v22, 0.0 }
 0x1d1   :  { %203 = vadd.xlane.f32.xlu0 %v202_v23 }
 0x25a   :  { %v200_v28 = vpop.xlane.xlu0 %199 }
 0x25b   :  { %v205_v29 = vmul.f32 0.03125, %v200_v28 }
 0x25d   :  { %v207_v31 = vmul.f32 %v205_v29, %v205_v29  ;;  %v210_v36 = vsub.f32 %v194_v19, %v205_v29 }
 0x25e   :  { %v204_v30 = vpop.xlane.xlu0 %203 }
 0x25f   :  { %v206_v32 = vmul.f32 0.03125, %v204_v30 }
 0x261   :  { %v208_v33 = vsub.f32 %v206_v32, %v207_v31 }
 0x263   :  { %v209_v34 = vmax.f32 %v208_v33, 0.0 }
 0x265   :  { %v211_v35 = vadd.f32 1e-05, %v209_v34 }
 0x267   :  { %515 = vrsqrt.f32 %v211_v35 }
 0x271   :  { %v516_v37 = vpop.eup %515 }
 0x272   :  { %v213_v39 = vmul.f32 %v516_v37, %v210_v36 }
 0x274   :  { %v220_v41 = vmul.f32 %v437_v38, %v213_v39 }
 0x276   :  { %v227_v42 = vadd.f32 %v438_v40, %v220_v41 }
 0x278   :  { %v228_v43 = vpack.c.bf16 %v227_v42, %v227_v42 }
 0x27a   :  { %486 = vmatmul.mubr.msk.bf16.vlgmr.msra.gmra.mrb[4].mxu0 %vm83_vm1, %v228_v43 }
 0x34d   :  { %v289_v47 = vpop.f32.mrb[4].mxu0 }
 0x34e   :  { %v290_v48 = vadd.f32 %v439_v46, %v289_v47  ;;  %v487_v49 = vpop.f32.mrb[5].mxu0 }
 0x34f   :  { %v292_v50 = vpop.f32.mrb[6].mxu0 }
 0x350   :  { %v295_v51 = vmax.f32 %v290_v48, 0.0  ;;  %v488_v52 = vpop.f32.mrb[7].mxu0 }
 0x352   :  { %v296_v53 = vpack.c.bf16 %v295_v51, %v295_v51 }
 0x354   :  { %498 = vmatmul.mubr.msk.bf16.vlgmr.msra.gmra.mrb[4].mxu1 %vm336_vm3, %v296_v53 }
 0x427   :  { %v374_v55 = vpop.f32.mrb[4].mxu1 }
 0x428   :  { %v375_v56 = vadd.f32 %v443_v54, %v374_v55  ;;  %v499_v57 = vpop.f32.mrb[5].mxu1 }
 0x429   :  { %v377_v58 = vpop.f32.mrb[6].mxu1 }
 0x42a   :  { %v380_v59 = vadd.f32 %v375_v56, %v227_v42  ;;  %v500_v60 = vpop.f32.mrb[7].mxu1 }
 0x42c   :  { %v383_v61 = vsel %vm197_vm2, %v380_v59, 0.0  ;;  %v386_v62 = vmul.f32 %v380_v59, %v380_v59 }
 0x42d   :  { %384 = vadd.xlane.f32.xlu1 %v383_v61 }
 0x42e   :  { %v387_v63 = vsel %vm197_vm2, %v386_v62, 0.0 }
 0x431   :  { %388 = vadd.xlane.f32.xlu1 %v387_v63 }
 0x4ba   :  { %v385_v0 = vpop.xlane.xlu1 %384 }
 0x4bb   :  { %v390_v1 = vmul.f32 0.03125, %v385_v0 }
 0x4bd   :  { %v392_v3 = vmul.f32 %v390_v1, %v390_v1  ;;  %v395_v8 = vsub.f32 %v380_v59, %v390_v1 }
 0x4be   :  { %v389_v2 = vpop.xlane.xlu1 %388 }
 0x4bf   :  { %v391_v4 = vmul.f32 0.03125, %v389_v2 }
 0x4c1   :  { %v393_v5 = vsub.f32 %v391_v4, %v392_v3 }
 0x4c3   :  { %v394_v6 = vmax.f32 %v393_v5, 0.0 }
 0x4c5   :  { %v396_v7 = vadd.f32 1e-05, %v394_v6 }
 0x4c7   :  { %517 = vrsqrt.f32 %v396_v7 }
 0x4d1   :  { %v518_v9 = vpop.eup %517 }
 0x4d2   :  { %v398_v11 = vmul.f32 %v518_v9, %v395_v8 }
 0x4d4   :  { %v405_v13 = vmul.f32 %v449_v10, %v398_v11 }
 0x4d6   :  { %v412_v14 = vadd.f32 %v450_v12, %v405_v13 }
 0x4d8   :  { %413 = vst.msk [vmem:[#allocation5] sm:$0x3] %vm197_vm2, %v412_v14 }
 0x4d9   :  { %552 = shalt.err (!%p549_p12)
}
 0x4da   :  { %s553_s2 = scalar_lea.hbm %s758_s13, 32 }
 0x4db   :  { %p554_p13 = scmp.ne.s32.totalorder %s758_s13, %s553_s2  ;;  %p557_p0 = scmp.lt.u32.totalorder %s553_s2, %s758_s13 }
 0x4dd   :  { %p559_p1 = pnand %p557_p0, %p554_p13 }
 0x4df   :  { %562 = shalt.err (!%p559_p1)
}
 0x4e0   :  { %423 = dma.vmem_to_hbm [thread:$0]  %s421_s27, 32, %s758_s13, [#allocation4]  }
 0x4e1   :  { %565 = dma.done.wait [#allocation4], 32  }
 0x4e2   :  { %566 = vsyncadd [#allocation4], 4294967264 }
 0x4e3   :  { %427 = vsyncpa [#allocation3], 1 }
 0x4e4   :  { %428 = vsyncpa [#allocation4], 1 }

</bundles_post_ra>
